<compile_context>
chip_gen: v5e
topology: v5e:2x2
jax: 0.10.0
libtpu: 0.0.40
codegen_flags: <defaults>
</compile_context>

<pallas_src>
import numpy as np
import jax
import jax.numpy as jnp
from jax.experimental import pallas as pl
from jax.experimental.pallas import tpu as pltpu

A0 = 0.5291772105638411
KE = 14.399645351950548
KEHALF = KE / 2.0
R_MASKED = 1e20  # masked / padded distance; exp(-a_k*a*R_MASKED) == 0 in f32


def _softplus_inverse(x):
    return np.log(np.expm1(x))


def _softplus(x):
    return np.log1p(np.exp(x))


def _round_up(x, m):
    return ((x + m - 1) // m) * m


def make_params():
    """Reproduce ZBLRepulsionEnergy.reset_parameters() + forward-time softplus
    and c-normalization. Returns an 11-element f32 vector:
    [adiv, apow, c1, c2, c3, c4, a1, a2, a3, a4, kehalf]."""
    raw = {
        "adiv": 1.0 / (0.8854 * A0),
        "apow": 0.23,
        "c1": 0.1818, "c2": 0.5099, "c3": 0.2802, "c4": 0.02817,
        "a1": 3.2, "a2": 0.9423, "a3": 0.4028, "a4": 0.2016,
    }
    sp = {k: _softplus(_softplus_inverse(v)) for k, v in raw.items()}
    csum = sp["c1"] + sp["c2"] + sp["c3"] + sp["c4"]
    params = np.array(
        [
            sp["adiv"], sp["apow"],
            sp["c1"] / csum, sp["c2"] / csum, sp["c3"] / csum, sp["c4"] / csum,
            sp["a1"], sp["a2"], sp["a3"], sp["a4"],
            KEHALF,
        ],
        dtype=np.float32,
    )
    return jnp.asarray(params)


def zbl_kernel(params_ref, zi_ref, zpi_ref, zj_ref, r_ref, out_ref):
    # tiles: zi/zpi (bm, 1) per-atom columns; zj (bm, bn) bf16; r (bm, bn)
    # f32 with mask folded in (masked/padded entries == R_MASKED).
    # out (bm, 1) f32 accumulator, resident across the neighbor-chunk axis.
    n = pl.program_id(1)

    adiv = params_ref[0]
    apow = params_ref[1]
    ck1, ck2, ck3, ck4 = (params_ref[2], params_ref[3],
                          params_ref[4], params_ref[5])   # kehalf folded in
    na1, na2, na3, na4 = (params_ref[6], params_ref[7],
                          params_ref[8], params_ref[9])   # pre-negated a_k

    @pl.when(n == 0)
    def _init():
        out_ref[...] = jnp.zeros_like(out_ref)

    zj = zj_ref[...].astype(jnp.float32)      # (bm, bn)  exact integers
    r = r_ref[...]                            # (bm, bn)
    zi = zi_ref[...]                          # (bm, 1)
    zpi = zpi_ref[...]                        # (bm, 1)

    # Z_j ** apow computed in-kernel (f32 EUP log/exp); saves a 4 B/elem stream.
    zpj = jnp.exp(apow * jnp.log(zj))

    a = (zpi + zpj) * adiv                    # (bm, bn)
    t = a * r                                 # masked pairs: huge -> f == 0
    f = (ck1 * jnp.exp(na1 * t) + ck2 * jnp.exp(na2 * t)
         + ck3 * jnp.exp(na3 * t) + ck4 * jnp.exp(na4 * t))

    corr = f * (zi * zj) / r                  # exactly 0 at masked/padded pairs

    # cross-lane (neighbor) reduction -> (bm, 1), accumulate in resident tile.
    out_ref[...] += jnp.sum(corr, axis=1, keepdims=True)


def zbl_pallas(atomic_numbers, neighbors, neighbor_mask, r_ij, params,
               block_m=512, block_n=1024):
    """atomic_numbers: (B, A) int, neighbors: (B, A, N) int,
    neighbor_mask / r_ij: (B, A, N) float32 -> (B, A, 1) float32.

    block_m must be a multiple of 16 (bf16 sublane tile), block_n a multiple
    of 128 (lane tile)."""
    B, A, N = neighbors.shape
    M = B * A
    apow = params[1]

    Zf = atomic_numbers.astype(jnp.float32)             # (B, A)
    Zp = Zf ** apow                                      # (B, A) Z^softplus(apow)

    # neighbor gather in the wrapper, directly in bf16 (exact for Z <= 118).
    nbr = neighbors.astype(jnp.int32)
    gather = jax.vmap(lambda vals, idx: vals[idx])       # (A,), (A,N) -> (A,N)
    z_j = gather(Zf.astype(jnp.bfloat16), nbr)           # (B, A, N) bf16

    # Fold the neighbor mask into r: masked pairs get a huge distance so the
    # kernel needs neither a mask stream nor a select.  (Ideally the distance
    # provider emits this slab directly; here it fuses with its production.)
    r_eff = jnp.where(neighbor_mask != 0, r_ij.astype(jnp.float32),
                      jnp.float32(R_MASKED))

    # Tiling: atoms on sublanes, neighbors on lanes (natural layout, no
    # transposes).  Cap the atom tile at cdiv(M,2) so the parallel axis has
    # >= 2 blocks for v7x's two TensorCores whenever M allows it.
    bm = min(block_m, _round_up(-(-M // 2), 16))          # multiple of 16
    bn = min(block_n, _round_up(N, 128))                  # multiple of 128
    Mp = _round_up(M, bm)
    Np = _round_up(N, bn)

    def pad_slab(x, val):
        x2 = x.reshape(M, N)
        if Mp == M and Np == N:
            return x2
        return jnp.pad(x2, ((0, Mp - M), (0, Np - N)), constant_values=val)

    def pad_col(x):
        x2 = x.reshape(M, 1)
        if Mp == M:
            return x2
        return jnp.pad(x2, ((0, Mp - M), (0, 0)))

    zj_p = pad_slab(z_j, 1.0)            # pad Z_j with 1 -> log() stays finite
    r_p = pad_slab(r_eff, R_MASKED)      # padded pairs behave like masked ones
    zi_col = pad_col(Zf)                 # (Mp, 1) f32
    zpi_col = pad_col(Zp)                # (Mp, 1) f32

    # kernel scalars: [adiv, apow, kehalf*c1..c4, -a1..-a4]  (folded host-side)
    kparams = jnp.concatenate(
        [params[0:2], params[2:6] * params[10], -params[6:10]]
    ).astype(jnp.float32)

    grid = (Mp // bm, Np // bn)          # atoms (parallel) x neighbor chunks

    out = pl.pallas_call(
        zbl_kernel,
        out_shape=jax.ShapeDtypeStruct((Mp, 1), jnp.float32),
        grid=grid,
        in_specs=[
            pl.BlockSpec(memory_space=pltpu.MemorySpace.SMEM),   # params
            pl.BlockSpec((bm, 1), lambda m, n: (m, 0)),          # Z_i
            pl.BlockSpec((bm, 1), lambda m, n: (m, 0)),          # Z_i^p
            pl.BlockSpec((bm, bn), lambda m, n: (m, n)),         # Z_j (bf16)
            pl.BlockSpec((bm, bn), lambda m, n: (m, n)),         # r (masked)
        ],
        out_specs=pl.BlockSpec((bm, 1), lambda m, n: (m, 0)),
        compiler_params=pltpu.CompilerParams(
            dimension_semantics=("parallel", "arbitrary")),
    )(kparams, zi_col, zpi_col, zj_p, r_p)

    return out[:M, 0].reshape(B, A, 1)


def zbl_reference(atomic_numbers, neighbors, neighbor_mask, r_ij, params):
    """Pure-JAX mirror of the PyTorch forward (torch.gather semantics)."""
    p = [params[i] for i in range(11)]
    adiv, apow, c1, c2, c3, c4, a1, a2, a3, a4, kehalf = p
    B, A, N = neighbors.shape
    Zf = atomic_numbers.astype(jnp.float32)[:, :, None]        # (B, A, 1)
    z_ex = jnp.broadcast_to(Zf, (B, A, A))
    z = z_ex ** apow
    a_full = (z + jnp.swapaxes(z, 1, 2)) * adiv
    a = jnp.take_along_axis(a_full, neighbors, axis=-1) * neighbor_mask
    zizj_full = z_ex * jnp.swapaxes(z_ex, 1, 2)
    zizj = jnp.take_along_axis(zizj_full, neighbors, axis=-1) * neighbor_mask
    f = (c1 * jnp.exp(-a1 * a * r_ij) + c2 * jnp.exp(-a2 * a * r_ij)
         + c3 * jnp.exp(-a3 * a * r_ij) + c4 * jnp.exp(-a4 * a * r_ij))
    corr = jnp.where(neighbor_mask != 0,
                     kehalf * f * zizj / r_ij, jnp.zeros_like(r_ij))
    return jnp.sum(corr, -1, keepdims=True)


if __name__ == "__main__":
    B, A = 2, 16
    N_real = A - 1          # real neighbors (all other atoms)
    N = 140                 # total columns incl. masked padding (schnetpack-style)

    key = jax.random.PRNGKey(0)
    k_pos, k_z = jax.random.split(key)

    R = jax.random.uniform(k_pos, (B, A, 3), jnp.float32, 0.5, 4.0)
    Zn = jax.random.randint(k_z, (B, A), 1, 10).astype(jnp.int32)

    nbr_real = np.stack(
        [np.array([j for j in range(A) if j != i], dtype=np.int32)
         for i in range(A)], axis=0)                      # (A, A-1)
    nbr_np = np.zeros((A, N), dtype=np.int32)
    nbr_np[:, :N_real] = nbr_real
    neighbors = jnp.asarray(np.broadcast_to(nbr_np, (B, A, N)).copy())

    mask_np = np.zeros((B, A, N), dtype=np.float32)
    mask_np[:, :, :N_real] = 1.0
    mask_np[1, :, N_real - 1] = 0.0       # also mask a *real* column in batch 1
    neighbor_mask = jnp.asarray(mask_np)

    # glue: pairwise distances r_ij (the module's distance_provider equivalent)
    Rn = jax.vmap(lambda Rb, nb: Rb[nb])(R, neighbors)    # (B, A, N, 3)
    r_ij = jnp.sqrt(jnp.sum((R[:, :, None, :] - Rn) ** 2, axis=-1))

    params = make_params()

    # block_n=128 forces two neighbor chunks -> exercises the accumulator path.
    out = zbl_pallas(Zn, neighbors, neighbor_mask, r_ij, params, block_n=128)
    out = jax.block_until_ready(out)

    ref = zbl_reference(Zn, neighbors, neighbor_mask, r_ij, params)
    assert out.shape == (B, A, 1) and out.dtype == jnp.float32
    # rtol deliberately 5e-5 (not 1e-5): the kernel evaluates Z_j**apow as
    # f32 exp(apow*log(Z_j)) on the EUP (per the perf review) instead of
    # streaming the wrapper-side pow; both are f32 but differ by a few ulps.
    np.testing.assert_allclose(np.asarray(out), np.asarray(ref),
                               rtol=5e-5, atol=1e-5)
    print("KERNEL_OK")
</pallas_src>

<mosaic_0001>
module attributes {stable_mosaic.version = 11 : i64} {
  func.func @zbl_kernel(%arg0: i32, %arg1: i32, %arg2: memref<10xf32, #tpu.memory_space<smem>>, %arg3: memref<16x1xf32, #tpu.memory_space<vmem>>, %arg4: memref<16x1xf32, #tpu.memory_space<vmem>>, %arg5: memref<16x128xbf16, #tpu.memory_space<vmem>>, %arg6: memref<16x128xf32, #tpu.memory_space<vmem>>, %arg7: memref<16x1xf32, #tpu.memory_space<vmem>>) attributes {dimension_semantics = [#tpu.dimension_semantics<parallel>, #tpu.dimension_semantics<arbitrary>], iteration_bounds = array<i64: 2, 2>, scalar_prefetch = 0 : i64, scratch_operands = 0 : i64, tpu.core_type = #tpu.core_type<tc>, window_params = [{transform_indices = @transform_0, window_bounds = array<i64: 10>}, {transform_indices = @transform_1, window_bounds = array<i64: 16, 1>}, {transform_indices = @transform_2, window_bounds = array<i64: 16, 1>}, {transform_indices = @transform_3, window_bounds = array<i64: 16, 128>}, {transform_indices = @transform_4, window_bounds = array<i64: 16, 128>}, {transform_indices = @transform_5, window_bounds = array<i64: 16, 1>}]} {
    %c0 = arith.constant 0 : index
    %0 = memref.load %arg2[%c0] : memref<10xf32, #tpu.memory_space<smem>>
    %c1 = arith.constant 1 : index
    %1 = memref.load %arg2[%c1] : memref<10xf32, #tpu.memory_space<smem>>
    %c2 = arith.constant 2 : index
    %2 = memref.load %arg2[%c2] : memref<10xf32, #tpu.memory_space<smem>>
    %c3 = arith.constant 3 : index
    %3 = memref.load %arg2[%c3] : memref<10xf32, #tpu.memory_space<smem>>
    %c4 = arith.constant 4 : index
    %4 = memref.load %arg2[%c4] : memref<10xf32, #tpu.memory_space<smem>>
    %c5 = arith.constant 5 : index
    %5 = memref.load %arg2[%c5] : memref<10xf32, #tpu.memory_space<smem>>
    %c6 = arith.constant 6 : index
    %6 = memref.load %arg2[%c6] : memref<10xf32, #tpu.memory_space<smem>>
    %c7 = arith.constant 7 : index
    %7 = memref.load %arg2[%c7] : memref<10xf32, #tpu.memory_space<smem>>
    %c8 = arith.constant 8 : index
    %8 = memref.load %arg2[%c8] : memref<10xf32, #tpu.memory_space<smem>>
    %c9 = arith.constant 9 : index
    %9 = memref.load %arg2[%c9] : memref<10xf32, #tpu.memory_space<smem>>
    %c0_i32 = arith.constant 0 : i32
    %10 = arith.cmpi eq, %arg1, %c0_i32 : i32
    %11 = arith.extui %10 : i1 to i32
    %c0_i32_0 = arith.constant 0 : i32
    %12 = arith.cmpi ne, %11, %c0_i32_0 : i32
    scf.if %12 {
      %cst_13 = arith.constant 0.000000e+00 : f32
      %59 = vector.broadcast %cst_13 : f32 to vector<16x1xf32>
      %c0_14 = arith.constant 0 : index
      %c0_15 = arith.constant 0 : index
      %60 = vector.load %arg7[%c0_14, %c0_15] : memref<16x1xf32, #tpu.memory_space<vmem>>, vector<16x1xf32>
      tpu.vector_store %arg7[%c0_14, %c0_15], %59 {strides = array<i32>} : memref<16x1xf32, #tpu.memory_space<vmem>>, vector<16x1xf32>,
    } else {
    }
    %c0_1 = arith.constant 0 : index
    %c0_2 = arith.constant 0 : index
    %13 = vector.load %arg5[%c0_1, %c0_2] : memref<16x128xbf16, #tpu.memory_space<vmem>>, vector<16x128xbf16>
    %14 = arith.extf %13 : vector<16x128xbf16> to vector<16x128xf32>
    %c0_3 = arith.constant 0 : index
    %c0_4 = arith.constant 0 : index
    %15 = vector.load %arg6[%c0_3, %c0_4] : memref<16x128xf32, #tpu.memory_space<vmem>>, vector<16x128xf32>
    %c0_5 = arith.constant 0 : index
    %c0_6 = arith.constant 0 : index
    %16 = vector.load %arg3[%c0_5, %c0_6] : memref<16x1xf32, #tpu.memory_space<vmem>>, vector<16x1xf32>
    %c0_7 = arith.constant 0 : index
    %c0_8 = arith.constant 0 : index
    %17 = vector.load %arg4[%c0_7, %c0_8] : memref<16x1xf32, #tpu.memory_space<vmem>>, vector<16x1xf32>
    %18 = math.log %14 : vector<16x128xf32>
    %19 = vector.broadcast %1 : f32 to vector<16x128xf32>
    %20 = arith.mulf %19, %18 : vector<16x128xf32>
    %21 = math.exp %20 : vector<16x128xf32>
    %22 = vector.broadcast %17 : vector<16x1xf32> to vector<16x128xf32>
    %23 = arith.addf %22, %21 : vector<16x128xf32>
    %24 = vector.broadcast %0 : f32 to vector<16x128xf32>
    %25 = arith.mulf %23, %24 : vector<16x128xf32>
    %26 = arith.mulf %25, %15 : vector<16x128xf32>
    %27 = vector.broadcast %6 : f32 to vector<16x128xf32>
    %28 = arith.mulf %27, %26 : vector<16x128xf32>
    %29 = math.exp %28 : vector<16x128xf32>
    %30 = vector.broadcast %2 : f32 to vector<16x128xf32>
    %31 = arith.mulf %30, %29 : vector<16x128xf32>
    %32 = vector.broadcast %7 : f32 to vector<16x128xf32>
    %33 = arith.mulf %32, %26 : vector<16x128xf32>
    %34 = math.exp %33 : vector<16x128xf32>
    %35 = vector.broadcast %3 : f32 to vector<16x128xf32>
    %36 = arith.mulf %35, %34 : vector<16x128xf32>
    %37 = arith.addf %31, %36 : vector<16x128xf32>
    %38 = vector.broadcast %8 : f32 to vector<16x128xf32>
    %39 = arith.mulf %38, %26 : vector<16x128xf32>
    %40 = math.exp %39 : vector<16x128xf32>
    %41 = vector.broadcast %4 : f32 to vector<16x128xf32>
    %42 = arith.mulf %41, %40 : vector<16x128xf32>
    %43 = arith.addf %37, %42 : vector<16x128xf32>
    %44 = vector.broadcast %9 : f32 to vector<16x128xf32>
    %45 = arith.mulf %44, %26 : vector<16x128xf32>
    %46 = math.exp %45 : vector<16x128xf32>
    %47 = vector.broadcast %5 : f32 to vector<16x128xf32>
    %48 = arith.mulf %47, %46 : vector<16x128xf32>
    %49 = arith.addf %43, %48 : vector<16x128xf32>
    %50 = vector.broadcast %16 : vector<16x1xf32> to vector<16x128xf32>
    %51 = arith.mulf %50, %14 : vector<16x128xf32>
    %52 = arith.mulf %49, %51 : vector<16x128xf32>
    %53 = arith.divf %52, %15 : vector<16x128xf32>
    %c0_9 = arith.constant 0 : index
    %c0_10 = arith.constant 0 : index
    %54 = vector.load %arg7[%c0_9, %c0_10] : memref<16x1xf32, #tpu.memory_space<vmem>>, vector<16x1xf32>
    %cst = arith.constant dense<0.000000e+00> : vector<16xf32>
    %55 = vector.multi_reduction <add>, %53, %cst [1] : vector<16x128xf32> to vector<16xf32>
    %56 = vector.shape_cast %55 : vector<16xf32> to vector<16x1xf32>
    %57 = arith.addf %54, %56 : vector<16x1xf32>
    %c0_11 = arith.constant 0 : index
    %c0_12 = arith.constant 0 : index
    %58 = vector.load %arg7[%c0_11, %c0_12] : memref<16x1xf32, #tpu.memory_space<vmem>>, vector<16x1xf32>
    tpu.vector_store %arg7[%c0_11, %c0_12], %57 {strides = array<i32>} : memref<16x1xf32, #tpu.memory_space<vmem>>, vector<16x1xf32>,
    return
  }
  func.func @transform_0(%arg0: i32, %arg1: i32) -> i32 {
    %c0_i32 = arith.constant 0 : i32
    %c0_i32_0 = arith.constant 0 : i32
    return %c0_i32 : i32
  }
  func.func @transform_1(%arg0: i32, %arg1: i32) -> (i32, i32) {
    %c0_i32 = arith.constant 0 : i32
    %c0_i32_0 = arith.constant 0 : i32
    return %arg0, %c0_i32 : i32, i32
  }
  func.func @transform_2(%arg0: i32, %arg1: i32) -> (i32, i32) {
    %c0_i32 = arith.constant 0 : i32
    %c0_i32_0 = arith.constant 0 : i32
    return %arg0, %c0_i32 : i32, i32
  }
  func.func @transform_3(%arg0: i32, %arg1: i32) -> (i32, i32) {
    %c0_i32 = arith.constant 0 : i32
    return %arg0, %arg1 : i32, i32
  }
  func.func @transform_4(%arg0: i32, %arg1: i32) -> (i32, i32) {
    %c0_i32 = arith.constant 0 : i32
    return %arg0, %arg1 : i32, i32
  }
  func.func @transform_5(%arg0: i32, %arg1: i32) -> (i32, i32) {
    %c0_i32 = arith.constant 0 : i32
    %c0_i32_0 = arith.constant 0 : i32
    return %arg0, %c0_i32 : i32, i32
  }
}

</mosaic_0001>

<bundles_post_ra>
// kernel: tpu_custom_call.1
= control target key start
LH: loop header
LB: loop body
LE: loop exit
PB: predicated region body
PF: predicated region fallthrough
CT: control target
= control target key end

     0   :  { %s1227_s0 = inlined_call_operand.vmem [shape: f32[10], index: 0, kind: input, shape index: {}]   ;;  %s1228_s1 = inlined_call_operand.vmem [shape: f32[32,1], index: 1, kind: input, shape index: {}]   ;;  %s1229_s2 = inlined_call_operand.vmem [shape: f32[32,1], index: 2, kind: input, shape index: {}]   ;;  %s1230_s3 = inlined_call_operand.hbm [shape: bf16[32,256], index: 3, kind: input, shape index: {}]   ;;  %s1231_s4 = inlined_call_operand.vmem [shape: f32[32,256], index: 4, kind: input, shape index: {}]   ;;  %s1232_s5 = inlined_call_operand.vmem [shape: f32[32,1], index: 5, kind: output, shape index: {}]  }
   0x1   :  { %1237 = sst [smem:[#allocation14_spill]] %s1227_s0 }
   0x2   :  { %10 = vsyncpa [#allocation4], 0 }
   0x3   :  { %11 = vsyncpa [#allocation3], 0 }
   0x4   :  { %13 = vsyncpa [#allocation3 + $0x1], 0  ;;  %s985_s18 = smov 0   ;;  %s987_s19 = smov 0  }
   0x5   :  { %s989_s20 = smov 0   ;;  %s991_s21 = smov 0  }
   0x6   :  { %s993_s22 = smov 0   ;;  %s995_s23 = smov 0  }
   0x7   :  { %s997_s24 = smov 0   ;;  %s999_s25 = smov 0  }
   0x8 LB: > { %1238 = sst [smem:[#allocation9_spill]] %s939_s23  ;;  %s681_s26 = sadd.s32 4294967295, %s947_s25   ;;  %s947_s25 = sphi %s999_s25, %s19_s25   ;;  %s943_s24 = sphi %s997_s24, %s1254_s24   ;;  %s939_s23 = sphi %s995_s23, %s1259_s23   ;;  %s935_s22 = sphi %s993_s22, %s1252_s22   ;;  %s931_s21 = sphi %s991_s21, %s1258_s21   ;;  %s927_s20 = sphi %s989_s20, %s1257_s20   ;;  %s923_s19 = sphi %s987_s19, %s1256_s19   ;;  %s919_s18 = sphi %s985_s18, %s1255_s18  }
   0x9   : > { %1239 = sst [smem:[#allocation10_spill]] %s943_s24  ;;  %s28_s27 = sadd.s32 1, %s939_s23 }
   0xa   : > { %p29_p0 = scmp.ge.s32.totalorder %s28_s27, 2  ;;  %s31_s28 = sadd.s32 1, %s943_s24 }
   0xb   : > { %s113_s29 = sadd.s32 1, %s927_s20  ;;  %p120_p1 = scmp.ne.s32.totalorder %s927_s20, %s923_s19 }
   0xc   : > { %s1261_s27 = smov (%p29_p0, %s28_s27), 0  ;;  %s1263_s28 = smov (!%p29_p0, %s31_s28), %s943_s24 }
   0xd   : > { %1240 = sst [smem:[#allocation11_spill]] %s1261_s27  ;;  %s109_s30 = ssub.s32 %s939_s23, %s1261_s27 }
   0xe   : > { %p121_p2 = scmp.eq.s32.totalorder %s947_s25, 0  ;;  %p33_p3 = scmp.ge.s32.totalorder %s1263_s28, 2 }
   0xf   : > { %p126_p4 = scmp.ne.s32.totalorder %s923_s19, %s919_s18  ;;  %p1040_p6 = scmp.eq.s32.totalorder %s681_s26, 0 }
  0x10   : > { %p1036_p5 = por %p121_p2, %p120_p1  ;;  %s1265_s28 = smov (%p33_p3, %s1263_s28), 0 }
  0x11   : > { %1243 = sst [smem:[#allocation12_spill]] %s1265_s28  ;;  %p1048_p7 = por %p1040_p6, %p126_p4 }
  0x12   : > { %p683_p8 = scmp.ge.s32.totalorder %s947_s25, 1  ;;  %s108_s9 = ssub.s32 %s943_s24, %s1265_s28 }
  0x13   : > { %p191_p9 = scmp.lt.s32.totalorder %s947_s25, 5  ;;  %s110_s10 = sor.u32 %s109_s30, %s108_s9 }
  0x14   : > { %p111_p10 = scmp.eq.s32.totalorder %s110_s10, 0  ;;  %s1246_s0 = sld [smem:[#allocation14_spill]] }
  0x15   : > { %p1056_p11 = pnand %p683_p8, %p191_p9  ;;  %s949_s16 = smov [#allocation2]  }
  0x16   : > { %s1064_s15 = scalar_select %p111_p10, %s927_s20, %s113_s29  }
  0x17   : > { %p728_p12 = pneg %p1056_p11  ;;  %p685_p0 = scmp.ge.s32.totalorder %s947_s25, 4 }
  0x18   : > { %1247 = sst [smem:[#allocation13_spill]] %s1064_s15  ;;  %s232_s17 = sand.u32 (!%p685_p0), 1, %s927_s20  }
  0x19   : > { %p729_p13 = pnand %p728_p12, %p1040_p6  ;;  %210 = sbr.rel (%p685_p0) target bundleno = 40 (0x28), region = 20 }
  0x1a   : > { %s203_s14 = sshll.u32 %s1246_s0, 4  ;;  %s716_s18 = sshll.u32 (!%p685_p0), %s943_s24, 2  ;;  %s204_s14 = int_to_ptr.vmem [resolvable:$true] %s203_s14 }
  0x1b   : > { %731 = dma.vmem_to_smem (!%p729_p13), %s204_s14, 16, %s949_s16, [#allocation4]  }
  0x1c   : > { %s686_s26 = sshll.u32 (!%p685_p0), %s232_s17, 3  ;;  %s241_s30 = sadd.s32 (!%p685_p0), %s939_s23, %s716_s18 }
  0x1d   : > { %s689_s29 = sshll.u32 (!%p685_p0), %s241_s30, 2  ;;  %s236_s9 = scalar_lea.vmem (!%p685_p0), [#allocation5], %s686_s26 }
  0x1e   : > { %s246_s10 = sshll.u32 %s236_s9, 4  ;;  %s243_s0 = scalar_lea.hbm %s1230_s3, %s689_s29  ;;  %s247_s10 = int_to_ptr.vmem [resolvable:$true] %s246_s10 }
  0x1f   : > { %s244_s14 = sshll.u32 %s243_s0, 4  ;;  %s233_s16 = scalar_lea.sflag [#allocation3], %s232_s17  ;;  %s245_s14 = int_to_ptr.hbm [resolvable:$true] %s244_s14 }
  0x20   : > { %s950_s28 = smov 128   ;;  %s951_s27 = smov 64  }
  0x21   : > { %s952_s15 = smov 4   ;;  %255 = sbr.rel (!%p1036_p5) target bundleno = 40 (0x28), region = 36 }
  0x22   : > { %724 = dma.hbm_to_vmem [thread:$0]  (%p1036_p5), %s245_s14, 128, %s247_s10, %s233_s16, %s950_s28, %s951_s27, %s952_s15  }
  0x23   : > { %s690_s18 = sshll.u32 (%p1036_p5), %s232_s17, 4  ;;  %s693_s24 = sshll.u32 (%p1036_p5), %s241_s30, 3 }
  0x24   : > { %s264_s23 = scalar_lea.vmem (%p1036_p5), %s1231_s4, %s693_s24  ;;  %s259_s29 = scalar_lea.vmem (%p1036_p5), [#allocation6], %s690_s18 }
  0x25   : > { %v295_v0 = vld [vmem:[%s264_s23] sm:$0xff] (%p1036_p5)  ;;  %v297_v1 = vld [vmem:[%s264_s23 + $0x10] sm:$0xff] (%p1036_p5) }
  0x26   : > { %296 = vst [vmem:[%s259_s29] sm:$0xff] %v295_v0 }
  0x27   : > { %298 = vst [vmem:[%s259_s29 + $0x8] sm:$0xff] %v297_v1 }
  0x28 PF: > { %307 = sbr.rel (%p1056_p11) target bundleno = 342 (0x156), region = 74 }
  0x2d   : > { %910 = dma.done.wait (%p1040_p6), [#allocation4], 16  }
  0x2e   : > { %912 = vsyncadd (%p1040_p6), [#allocation4], 4294967280  ;;  %s314_s0 = sand.u32 1, %s923_s19  }
  0x2f   : > { %s696_s24 = sshll.u32 %s314_s0, 3  ;;  %s315_s27 = scalar_lea.sflag [#allocation3], %s314_s0 }
  0x30   : > { %s1091_s23 = scalar_lea.vmem [#allocation5], %s696_s24 }
  0x31   : > { %914 = dma.done.wait (%p1048_p7), %s315_s27, 128  }
  0x32   : > { %916 = vsyncadd (%p1048_p7), %s315_s27, 4294967168  ;;  %s697_s28 = sshll.u32 %s314_s0, 4 }
  0x33   : > { %s1097_s6 = scalar_lea.vmem [#allocation6], %s697_s28 }
  0x34   : > { %331 = sfence }
  0x35   : > { %s698_s11 = sshll.u32 %s935_s22, 1  ;;  %s1100_s7 = sld [smem:[#allocation2]] }
  0x36   : > { %p369_p1 = scmp.lt.s32.totalorder %s698_s11, 3  ;;  %s1102_s15 = sld [smem:[#allocation2 + $0x1]] }
  0x37   : > { %s1104_s17 = sld [smem:[#allocation2 + $0x2]]  ;;  %p713_p2 = scmp.ne.s32.totalorder %s931_s21, 0 }
  0x38   : > { %s1267_s11 = smov (!%p369_p1, %s698_s11), 3  ;;  %s1106_s30 = sld [smem:[#allocation2 + $0x3]] }
  0x39   : > { %s699_s10 = sshll.u32 %s1267_s11, 3  ;;  %s1108_s12 = sld [smem:[#allocation2 + $0x4]] }
  0x3a   : > { %s372_s14 = scalar_lea.vmem %s1228_s1, %s699_s10  ;;  %s378_s22 = scalar_lea.vmem %s1229_s2, %s699_s10 }
  0x3b   : > { %s1119_s29 = scalar_lea.vmem %s1232_s5, %s699_s10  ;;  %s1121_s0 = sld [smem:[#allocation2 + $0x5]] }
  0x3c   : > { %s1123_s24 = sld [smem:[#allocation2 + $0x6]]  ;;  %401 = sbr.rel (%p713_p2) target bundleno = 68 (0x44), region = 90 }
  0x3d   : > { %s1125_s27 = sld [smem:[#allocation2 + $0x7]] }
  0x3e   : > { %s1127_s28 = sld [smem:[#allocation2 + $0x8]] }
  0x3f   : > { %s1129_s11 = sld [smem:[#allocation2 + $0x9]] }
  0x41   : > { %vm402_vm0 = vcmask 7168   ;;  %v953_v2 = vmov 0.0  }
  0x42   : > { %403 = vst.msk [vmem:[%s1119_s29] sm:$0xff] %vm402_vm0, %v953_v2 }
  0x43   : > { %404 = vst.msk [vmem:[%s1119_s29 + $0x8] sm:$0xff] %vm402_vm0, %v953_v2 }
  0x44 PF: > { %v413_v3 = vld [vmem:[%s378_s22] sm:$0xff]  ;;  %v954_v5 = vmov 0   ;;  %v414_v6 = vld [vmem:[%s378_s22 + $0x8] sm:$0xff]  ;;  %v419_v13 = vstv %s1102_s15  ;;  %v438_v22 = vstv %s1100_s7  ;;  %vm541_vm9 = vcmask 7168  }
  0x45   : > { %v411_v4 = vld [vmem:[%s372_s14] sm:$0xff]  ;;  %804 = vset.pattern.permute.xlu0 %v954_v5  ;;  %805 = vset.pattern.permute.xlu1 %v954_v5  ;;  %v412_v7 = vld [vmem:[%s372_s14 + $0x8] sm:$0xff]  ;;  %v443_v26 = vstv %s1123_s24  ;;  %v453_v28 = vstv %s1125_s27 }
  0x46   : > { %428 = vperm.xlu0 %804, %v413_v3   ;;  %491 = vperm.xlu1 %805, %v411_v4   ;;  %v1135_v8 = vld [vmem:[%s1091_s23] sm:$0xff]   ;;  %v1145_v19 = vld [vmem:[%s1097_s6] sm:$0xff]  ;;  %v465_v29 = vstv %s1127_s28  ;;  %v477_v30 = vstv %s1129_s11 }
  0x47   : > { %v720_v9 = vunpack.c.l.bf16 %v1135_v8  ;;  %v721_v10 = vunpack.c.h.bf16 %v1135_v8  ;;  %v1156_v31 = vld [vmem:[%s1097_s6 + $0x8] sm:$0xff]  ;;  %v450_v49 = vstv %s1104_s17  ;;  %v460_v56 = vstv %s1106_s30 }
  0x48   : > { %vm508_vm1 = vweird.f32 %v1145_v19  ;;  %v514_v57 = vand.u32 2147483648, %v1145_v19  ;;  %v472_v62 = vstv %s1108_s12  ;;  %v512_v3 = vand.u32 2147483647, %v1145_v19 }
  0x49   : > { %806 = vlog2.f32 %v720_v9  ;;  %vm523_vm5 = vweird.f32 %v1156_v31 }
  0x4a   : > { %808 = vlog2.f32 %v721_v10  ;;  %vm513_vm4 = vcmp.eq.f32.partialorder %v512_v3, 8.507059e+37 }
  0x4e   : > { %433 = vperm.xlu0 %804, %v414_v6   ;;  %496 = vperm.xlu1 %805, %v412_v7  }
  0x4f   : > { %v807_v11 = vpop.eup %806 }
  0x50   : > { %v416_v12 = vmul.f32 0.6931472, %v807_v11  ;;  %v809_v15 = vpop.eup %808 }
  0x51   : > { %v418_v17 = vmul.f32 0.6931472, %v809_v15 }
  0x52   : > { %v420_v14 = vmul.f32 %v419_v13, %v416_v12 }
  0x53   : > { %v421_v18 = vmul.f32 %v419_v13, %v418_v17  ;;  %v484_v13 = vstv %s1121_s0  ;;  %v515_v17 = vor.u32 1.1754944e-38, %v514_v57 }
  0x54   : > { %v422_v16 = vmul.f32 1.442695, %v420_v14 }
  0x55   : > { %v424_v20 = vmul.f32 1.442695, %v421_v18 }
  0x56   : > { %810 = vpow2.f32 %v422_v16 }
  0x57   : > { %812 = vrcp.f32 %v1145_v19 }
  0x58   : > { %814 = vpow2.f32 %v424_v20 }
  0x59   : > { %816 = vrcp.f32 %v1156_v31 }
  0x5c   : > { %v811_v21 = vpop.eup %810 }
  0x5d   : > { %v1149_v25 = vpop.eup %812 }
  0x5e   : > { %v815_v33 = vpop.eup %814  ;;  %v504_v34 = vmul.f32 %v1149_v25, %v1145_v19  ;;  %vm509_vm2 = vweird.f32 %v1149_v25 }
  0x5f   : > { %v1162_v46 = vpop.eup %816  ;;  %vm1180_vm3 = vmor %vm508_vm1, %vm509_vm2 }
  0x60   : > { %v505_v45 = vsub.f32 1.0, %v504_v34  ;;  %v519_v51 = vmul.f32 %v1162_v46, %v1156_v31  ;;  %vm524_vm6 = vweird.f32 %v1162_v46 }
  0x61   : > { %vm525_vm7 = vmor %vm523_vm5, %vm524_vm6 }
  0x62   : > { %v506_v50 = vmul.f32 %v1149_v25, %v505_v45  ;;  %v520_v7 = vsub.f32 1.0, %v519_v51 }
  0x64   : > { %v507_v2 = vadd.f32 %v1149_v25, %v506_v50 }
  0x66   : > { %v511_v16 = vsel %vm1180_vm3, %v1149_v25, %v507_v2  ;;  %v529_v25 = vand.u32 2147483648, %v1156_v31 }
  0xb8   : > { %v429_v23 = vpop.permute.xlu0 %428  ;;  %v492_v12 = vpop.permute.xlu1 %491 }
  0xb9   : > { %v436_v24 = vadd.f32 %v811_v21, %v429_v23  ;;  %v499_v18 = vmul.f32 %v720_v9, %v492_v12  ;;  %v521_v21 = vmul.f32 %v1162_v46, %v520_v7 }
  0xbb   : > { %v439_v27 = vmul.f32 %v438_v22, %v436_v24  ;;  %v522_v9 = vadd.f32 %v1162_v46, %v521_v21 }
  0xbd   : > { %v441_v32 = vmul.f32 %v439_v27, %v1145_v19  ;;  %v516_v27 = vsel %vm513_vm4, %v515_v17, %v511_v16 }
  0xbf   : > { %v444_v35 = vmul.f32 %v443_v26, %v441_v32  ;;  %v454_v36 = vmul.f32 %v453_v28, %v441_v32  ;;  %v466_v37 = vmul.f32 %v465_v29, %v441_v32  ;;  %v478_v38 = vmul.f32 %v477_v30, %v441_v32 }
  0xc0   : > { %v434_v39 = vpop.permute.xlu0 %433  ;;  %v527_v32 = vand.u32 2147483647, %v1156_v31 }
  0xc1   : > { %v446_v40 = vmul.f32 1.442695, %v444_v35  ;;  %v456_v41 = vmul.f32 1.442695, %v454_v36  ;;  %v468_v42 = vmul.f32 1.442695, %v466_v37  ;;  %v437_v43 = vadd.f32 %v815_v33, %v434_v39  ;;  %v497_v37 = vpop.permute.xlu1 %496 }
  0xc2   : > { %v480_v44 = vmul.f32 1.442695, %v478_v38  ;;  %v530_v38 = vor.u32 1.1754944e-38, %v529_v25  ;;  %vm528_vm8 = vcmp.eq.f32.partialorder %v527_v32, 8.507059e+37 }
  0xc3   : > { %818 = vpow2.f32 %v446_v40  ;;  %v440_v47 = vmul.f32 %v438_v22, %v437_v43 }
  0xc4   : > { %820 = vpow2.f32 %v456_v41  ;;  %v526_v41 = vsel %vm525_vm7, %v1162_v46, %v522_v9 }
  0xc5   : > { %822 = vpow2.f32 %v468_v42  ;;  %v442_v48 = vmul.f32 %v440_v47, %v1156_v31  ;;  %v500_v31 = vmul.f32 %v721_v10, %v497_v37  ;;  %v531_v43 = vsel %vm528_vm8, %v530_v38, %v526_v41  ;;  %v533_v47 = vld [vmem:[%s1119_s29] sm:$0xff] }
  0xc6   : > { %824 = vpow2.f32 %v480_v44 }
  0xc7   : > { %v445_v52 = vmul.f32 %v443_v26, %v442_v48  ;;  %v455_v53 = vmul.f32 %v453_v28, %v442_v48  ;;  %v467_v54 = vmul.f32 %v465_v29, %v442_v48  ;;  %v479_v55 = vmul.f32 %v477_v30, %v442_v48 }
  0xc9   : > { %v819_v58 = vpop.eup %818  ;;  %v448_v59 = vmul.f32 1.442695, %v445_v52  ;;  %v458_v60 = vmul.f32 1.442695, %v455_v53  ;;  %v470_v61 = vmul.f32 1.442695, %v467_v54 }
  0xca   : > { %v821_v63 = vpop.eup %820  ;;  %v482_v0 = vmul.f32 1.442695, %v479_v55  ;;  %v451_v1 = vmul.f32 %v819_v58, %v450_v49 }
  0xcb   : > { %v823_v4 = vpop.eup %822  ;;  %826 = vpow2.f32 %v448_v59  ;;  %v461_v5 = vmul.f32 %v821_v63, %v460_v56 }
  0xcc   : > { %v825_v11 = vpop.eup %824  ;;  %828 = vpow2.f32 %v458_v60  ;;  %v473_v15 = vmul.f32 %v823_v4, %v472_v62 }
  0xcd   : > { %830 = vpow2.f32 %v470_v61  ;;  %v463_v14 = vadd.f32 %v461_v5, %v451_v1  ;;  %v485_v20 = vmul.f32 %v825_v11, %v484_v13 }
  0xce   : > { %832 = vpow2.f32 %v482_v0 }
  0xcf   : > { %v475_v19 = vadd.f32 %v473_v15, %v463_v14 }
  0xd1   : > { %v827_v22 = vpop.eup %826  ;;  %v487_v23 = vadd.f32 %v485_v20, %v475_v19 }
  0xd2   : > { %v829_v24 = vpop.eup %828  ;;  %v452_v26 = vmul.f32 %v827_v22, %v450_v49  ;;  %v534_v49 = vld [vmem:[%s1119_s29 + $0x8] sm:$0xff] }
  0xd3   : > { %v831_v28 = vpop.eup %830  ;;  %v462_v29 = vmul.f32 %v829_v24, %v460_v56  ;;  %v501_v30 = vmul.f32 %v499_v18, %v487_v23 }
  0xd4   : > { %v833_v33 = vpop.eup %832  ;;  %v474_v35 = vmul.f32 %v831_v28, %v472_v62 }
  0xd5   : > { %v464_v34 = vadd.f32 %v462_v29, %v452_v26  ;;  %v517_v36 = vmul.f32 %v516_v27, %v501_v30  ;;  %v486_v40 = vmul.f32 %v833_v33, %v484_v13 }
  0xd7   : > { %v476_v39 = vadd.f32 %v474_v35, %v464_v34  ;;  %535 = vadd.xlane.f32.xlu2 %v517_v36 }
  0xd9   : > { %v488_v42 = vadd.f32 %v486_v40, %v476_v39 }
  0xdb   : > { %v502_v44 = vmul.f32 %v500_v31, %v488_v42 }
  0xdd   : > { %v532_v45 = vmul.f32 %v531_v43, %v502_v44 }
  0xdf   : > { %537 = vadd.xlane.f32.xlu2 %v532_v45 }
 0x14a   : > { %v536_v48 = vpop.xlane.xlu2 %535 }
 0x14b   : > { %v539_v50 = vadd.f32 %v536_v48, %v533_v47 }
 0x14d   : > { %542 = vst.msk [vmem:[%s1119_s29] sm:$0xff] %vm541_vm9, %v539_v50 }
 0x152   : > { %v538_v51 = vpop.xlane.xlu2 %537 }
 0x153   : > { %v540_v52 = vadd.f32 %v538_v51, %v534_v49 }
 0x155   : > { %543 = vst.msk [vmem:[%s1119_s29 + $0x8] sm:$0xff] %vm541_vm9, %v540_v52 }
 0x156 PF: > { %s19_s25 = sadd.s32 1, %s947_s25   ;;  %s1250_s21 = sld [smem:[#allocation13_spill]] }
 0x157   : > { %p16_p3 = scmp.ge.s32.totalorder %s19_s25, 6   ;;  %s1251_s23 = sld [smem:[#allocation9_spill]] }
 0x158   : > { %s1252_s22 = sld [smem:[#allocation10_spill]]  ;;  %s1255_s18 = smov %s923_s19 }
 0x159   : > { %s1253_s6 = sld [smem:[#allocation11_spill]]  ;;  %s1256_s19 = smov %s927_s20 }
 0x15a   : > { %s1254_s24 = sld [smem:[#allocation12_spill]] }
 0x15b   :  { %18 = sbr.rel (!%p16_p3) target bundleno = 8 (0x8), region = 141 }
 0x15c   : > { %s1257_s20 = smov %s1250_s21 }
 0x15d   : > { %s1258_s21 = smov %s1251_s23 }
 0x15f   : > { %s1259_s23 = smov %s1253_s6 }
 0x160   :  { %566 = vsyncpa [#allocation3], 1 }
 0x161   :  { %568 = vsyncpa [#allocation3 + $0x1], 1 }
 0x162   :  { %569 = vsyncpa [#allocation4], 1 }
 0x163   :  { %571 = vsyncpa [#allocation4 + $0x1], 1 }

</bundles_post_ra>
